<compile_context>
chip_gen: v7x
topology: tpu7x:2x2x1
jax: 0.10.0
libtpu: 0.0.40
codegen_flags: <defaults>
</compile_context>

<pallas_src>
import jax
import jax.numpy as jnp
from jax.experimental import pallas as pl
from jax.experimental.pallas import tpu as pltpu


def regressor_kernel(x_ref, w_ref, b_ref, o_ref):
    # x_ref: (B, T, C)  VMEM
    # w_ref: (C, 2H+1) = [Wk | Wv@Wfc | Wq]  VMEM
    # b_ref: (1, 1) fc bias  SMEM
    # o_ref: (B, 1)  VMEM
    B, T, C = x_ref.shape
    n = w_ref.shape[1]
    H = (n - 1) // 2
    scale = jnp.float32(C) ** jnp.float32(-0.5)
    inv_t = jnp.float32(1.0 / T)

    # Single flattened MXU projection for the whole batch (layout no-op reshape:
    # second-minor dim is a multiple of 8, last dim unchanged).
    x_flat = x_ref[...].reshape(B * T, C)
    proj = jnp.dot(x_flat, w_ref[...],
                   preferred_element_type=jnp.float32)        # (B*T, 2H+1)
    proj = proj.reshape(B, T, n)

    k = proj[:, :, :H]                # (B, T, H)  x @ Wk
    a = proj[:, :, H:H + 1]           # (B, T, 1)  x @ (Wv @ Wfc)  (fc folded in)
    q = proj[:, :, H + 1:]            # (B, T, H)  x @ Wq

    # No softmax => mean_T((q @ k^T) @ v) == (mean_T(q) @ k^T) @ v  (exact).
    q_bar = jnp.sum(q, axis=1, keepdims=True) * inv_t          # (B, 1, H) sublane reduce
    scores = jnp.sum(k * q_bar, axis=-1, keepdims=True)        # (B, T, 1) lane reduce
    y = jnp.sum(scores * a, axis=1) * scale + b_ref[0, 0]      # (B, 1)
    o_ref[...] = y.astype(o_ref.dtype)


@jax.jit
def regressor_forward(x, wk, wq, wv, wfc, bfc):
    """x: (B, T, C); wk/wq/wv: (C, H); wfc: (H, 1); bfc: (1, 1) -> (B, 1)."""
    B, T, C = x.shape
    H = wk.shape[1]
    u = wv @ wfc                                      # (C, 1): fold fc weight into value proj
    w_packed = jnp.concatenate([wk, u, wq], axis=1)   # (C, 2H+1), built once in XLA

    out = pl.pallas_call(
        regressor_kernel,
        out_shape=jax.ShapeDtypeStruct((B, 1), jnp.float32),
        in_specs=[
            pl.BlockSpec(memory_space=pltpu.MemorySpace.VMEM),   # x, full array
            pl.BlockSpec(memory_space=pltpu.MemorySpace.VMEM),   # packed weights
            pl.BlockSpec(memory_space=pltpu.MemorySpace.SMEM),   # fc bias scalar
        ],
        out_specs=pl.BlockSpec(memory_space=pltpu.MemorySpace.VMEM),
    )(x, w_packed, bfc)
    return out


def reference_forward(x, wk, wq, wv, wfc, bfc):
    C = x.shape[-1]
    k = x @ wk
    q = x @ wq
    v = x @ wv
    wei = (q @ jnp.swapaxes(k, -2, -1)) * (C ** -0.5)
    out = wei @ v
    out = out.mean(axis=1)
    return out @ wfc + bfc[0]


if __name__ == "__main__":
    # Small shapes consistent with the module: batch=2, seq=8, embedding=32, head_size=16
    B, T, C, H = 2, 8, 32, 16

    key = jax.random.PRNGKey(0)
    kx, kk, kq, kv, kf, kb = jax.random.split(key, 6)

    x = jax.random.normal(kx, (B, T, C), dtype=jnp.float32)

    # Deterministic parameter init (uniform, PyTorch-Linear-like fan_in scaling).
    def lin_init(k, fan_in, shape):
        bound = 1.0 / (fan_in ** 0.5)
        return jax.random.uniform(k, shape, jnp.float32, -bound, bound)

    wk = lin_init(kk, C, (C, H))     # key.weight^T
    wq = lin_init(kq, C, (C, H))     # query.weight^T
    wv = lin_init(kv, C, (C, H))     # value.weight^T
    wfc = lin_init(kf, H, (H, 1))    # fc.weight^T
    bfc = lin_init(kb, H, (1, 1))    # fc.bias

    y = regressor_forward(x, wk, wq, wv, wfc, bfc)
    jax.block_until_ready(y)

    y_ref = reference_forward(x, wk, wq, wv, wfc, bfc)
    assert y.shape == (B, 1)
    assert jnp.allclose(y, y_ref, atol=1e-4, rtol=1e-4)

    print("KERNEL_OK")
</pallas_src>

<mosaic_0001>
module attributes {stable_mosaic.version = 11 : i64} {
  func.func @regressor_kernel(%arg0: memref<2x8x32xf32, #tpu.memory_space<vmem>>, %arg1: memref<32x33xf32, #tpu.memory_space<vmem>>, %arg2: memref<1x1xf32, #tpu.memory_space<smem>>, %arg3: memref<2x1xf32, #tpu.memory_space<vmem>>) attributes {dimension_semantics = [], scalar_prefetch = 0 : i64, scratch_operands = 0 : i64, tpu.core_type = #tpu.core_type<tc>} {
    %cst = arith.constant 3.200000e+01 : f32
    %cst_0 = arith.constant -5.000000e-01 : f32
    %0 = math.powf %cst, %cst_0 : f32
    %c0 = arith.constant 0 : index
    %c0_1 = arith.constant 0 : index
    %c0_2 = arith.constant 0 : index
    %1 = vector.load %arg0[%c0, %c0_1, %c0_2] : memref<2x8x32xf32, #tpu.memory_space<vmem>>, vector<2x8x32xf32>
    %2 = vector.shape_cast %1 : vector<2x8x32xf32> to vector<16x32xf32>
    %c0_3 = arith.constant 0 : index
    %c0_4 = arith.constant 0 : index
    %3 = vector.load %arg1[%c0_3, %c0_4] : memref<32x33xf32, #tpu.memory_space<vmem>>, vector<32x33xf32>
    %cst_5 = arith.constant dense<0.000000e+00> : vector<16x33xf32>
    %4 = tpu.matmul %2, %3, %cst_5 {dimension_numbers = #tpu.dot_dimension_numbers<[1], [0], [0], [1], [0, 0, 1, 1], [], []>} : vector<16x32xf32>, vector<32x33xf32>, vector<16x33xf32> -> vector<16x33xf32>
    %5 = vector.shape_cast %4 : vector<16x33xf32> to vector<2x8x33xf32>
    %6 = vector.extract_strided_slice %5 {offsets = [0, 0, 0], sizes = [2, 8, 16], strides = [1, 1, 1]} : vector<2x8x33xf32> to vector<2x8x16xf32>
    %7 = vector.extract_strided_slice %5 {offsets = [0, 0, 16], sizes = [2, 8, 1], strides = [1, 1, 1]} : vector<2x8x33xf32> to vector<2x8x1xf32>
    %8 = vector.extract_strided_slice %5 {offsets = [0, 0, 17], sizes = [2, 8, 16], strides = [1, 1, 1]} : vector<2x8x33xf32> to vector<2x8x16xf32>
    %cst_6 = arith.constant dense<0.000000e+00> : vector<2x16xf32>
    %9 = vector.multi_reduction <add>, %8, %cst_6 [1] : vector<2x8x16xf32> to vector<2x16xf32>
    %10 = vector.shape_cast %9 : vector<2x16xf32> to vector<2x1x16xf32>
    %cst_7 = arith.constant 1.250000e-01 : f32
    %11 = vector.broadcast %cst_7 : f32 to vector<2x1x16xf32>
    %12 = arith.mulf %10, %11 : vector<2x1x16xf32>
    %13 = vector.broadcast %12 : vector<2x1x16xf32> to vector<2x8x16xf32>
    %14 = arith.mulf %6, %13 : vector<2x8x16xf32>
    %cst_8 = arith.constant dense<0.000000e+00> : vector<2x8xf32>
    %15 = vector.multi_reduction <add>, %14, %cst_8 [2] : vector<2x8x16xf32> to vector<2x8xf32>
    %16 = vector.shape_cast %15 : vector<2x8xf32> to vector<2x8x1xf32>
    %17 = arith.mulf %16, %7 : vector<2x8x1xf32>
    %cst_9 = arith.constant dense<0.000000e+00> : vector<2x1xf32>
    %18 = vector.multi_reduction <add>, %17, %cst_9 [1] : vector<2x8x1xf32> to vector<2x1xf32>
    %19 = vector.broadcast %0 : f32 to vector<2x1xf32>
    %20 = arith.mulf %18, %19 : vector<2x1xf32>
    %c0_10 = arith.constant 0 : index
    %c0_11 = arith.constant 0 : index
    %21 = memref.load %arg2[%c0_10, %c0_11] : memref<1x1xf32, #tpu.memory_space<smem>>
    %22 = vector.broadcast %21 : f32 to vector<2x1xf32>
    %23 = arith.addf %20, %22 : vector<2x1xf32>
    %c0_12 = arith.constant 0 : index
    %c0_13 = arith.constant 0 : index
    %24 = vector.load %arg3[%c0_12, %c0_13] : memref<2x1xf32, #tpu.memory_space<vmem>>, vector<2x1xf32>
    tpu.vector_store %arg3[%c0_12, %c0_13], %23 {strides = array<i32>} : memref<2x1xf32, #tpu.memory_space<vmem>>, vector<2x1xf32>,
    return
  }
}

</mosaic_0001>

<bundles_post_ra>
// kernel: regressor_forward.1
= control target key start
LH: loop header
LB: loop body
LE: loop exit
PB: predicated region body
PF: predicated region fallthrough
CT: control target
= control target key end

     0   :  { %vm21_vm0 = vcmask 261120   ;;  %vm103_vm1 = vcmask 269448   ;;  %vm130_vm2 = vcmask 130048   ;;  %vm139_vm3 = vcmask 138368   ;;  %s203_s25 = smov 112   ;;  %s248_s1 = inlined_call_operand.vmem [shape: f32[32,33], index: 1, kind: input, shape index: {}]   ;;  %s249_s0 = inlined_call_operand.vmem [shape: f32[2,8,32], index: 0, kind: input, shape index: {}]   ;;  %s250_s2 = inlined_call_operand.<no memory space> [shape: f32[1,1], index: 2, kind: input, shape index: {}]   ;;  %s251_s3 = inlined_call_operand.vmem [shape: f32[2,1], index: 3, kind: output, shape index: {}]  }
   0x1   :  { %v17_v0 = vld [vmem:[%s248_s1] sm:$0xff]  ;;  %v18_v1 = vld [vmem:[%s248_s1 + $0x8] sm:$0xff]  ;;  %v19_v2 = vld [vmem:[%s248_s1 + $0x10] sm:$0xff]  ;;  %v157_v51 = vstv %s250_s2  ;;  %vm162_vm4 = vcmask 1041409   ;;  %vm167_vm5 = vcmask 1024  }
   0x2   :  { %v192_v3 = vpack.c.bf16 %v18_v1, %v17_v0  ;;  %v20_v4 = vld [vmem:[%s248_s1 + $0x18] sm:$0xff]  ;;  %v15_v5 = vld [vmem:[%s249_s0] sm:$0xff]  ;;  %v16_v7 = vld [vmem:[%s249_s0 + $0x8] sm:$0xff]  ;;  %s202_s0 = smov 111  }
   0x3   :  { %v196_v6 = vpack.c.bf16 %v20_v4, %v19_v2  ;;  %189 = vmatprep.mubr.msk.f32.mxu0 %vm21_vm0, %v15_v5 }
   0x4   :  { %193 = vmatprep.subr.bf16.mxu0 %v192_v3 }
   0x5   :  { %195 = vmatpush3.bf16.msra.mxu0 %v192_v3 }
   0x6   :  { %197 = vmatprep.subr.bf16.mxu0 %v196_v6 }
   0x9   :  { %199 = vmatpush3.bf16.msra.mxu0 %v196_v6 }
   0xc   :  { %190 = vmatmul.mubr.msk.f32.vlgmr.msra.gmra.mrb[0].mxu0 %vm21_vm0, %v16_v7 }
  0xdf   :  { %v191_v8 = vpop.f32.mrb[0].mxu0 }
  0xe0   :  { %v94_v9 = vpop.f32.mrb[1].mxu0  ;;  %v111_v10 = vsel %vm103_vm1, %v191_v8, 0.0 }
  0xe1   :  { %v104_v11 = vsel %vm103_vm1, %v94_v9, 0.0  ;;  %v112_v12 = vrot.slane %v111_v10, 4 }
  0xe2   :  { %v105_v13 = vrot.slane %v104_v11, 4 }
  0xe3   :  { %v113_v14 = vadd.f32 %v112_v12, %v111_v10 }
  0xe4   :  { %v106_v15 = vadd.f32 %v105_v13, %v104_v11 }
  0xe5   :  { %v114_v16 = vrot.slane %v113_v14, 2 }
  0xe6   :  { %v107_v17 = vrot.slane %v106_v15, 2 }
  0xe7   :  { %v115_v18 = vadd.f32 %v114_v16, %v113_v14 }
  0xe8   :  { %v108_v19 = vadd.f32 %v107_v17, %v106_v15 }
  0xe9   :  { %v116_v21 = vrot.slane %v115_v18, 1 }
  0xea   :  { %v109_v20 = vrot.slane %v108_v19, 1 }
  0xeb   :  { %v117_v24 = vadd.f32 %v116_v21, %v115_v18 }
  0xec   :  { %v110_v22 = vadd.f32 %v109_v20, %v108_v19 }
  0xed   :  { %v119_v25 = vmul.f32 0.125, %v117_v24 }
  0xee   :  { %v118_v23 = vmul.f32 0.125, %v110_v22 }
  0xf0   :  { %122 = vrot.lane.b32.xlu0 %v118_v23, %s202_s0 }
  0xf4   :  { %124 = vrot.lane.b32.xlu0 %v119_v25, %s202_s0 }
 0x162   :  { %v123_v26 = vpop.permute.xlu0 %122 }
 0x163   :  { %v128_v27 = vmul.f32 %v123_v26, %v94_v9 }
 0x165   :  { %v131_v28 = vsel %vm130_vm2, %v128_v27, 0.0 }
 0x166   :  { %132 = vadd.xlane.f32.xlu1 %v131_v28  ;;  %v125_v29 = vpop.permute.xlu0 %124 }
 0x167   :  { %v129_v30 = vmul.f32 %v191_v8, %v125_v29 }
 0x169   :  { %v134_v31 = vsel %vm130_vm2, %v129_v30, 0.0 }
 0x16a   :  { %135 = vadd.xlane.f32.xlu1 %v134_v31 }
 0x1f3   :  { %v133_v32 = vpop.xlane.xlu1 %132 }
 0x1f4   :  { %v137_v33 = vmul.f32 %v133_v32, %v94_v9 }
 0x1f6   :  { %v140_v34 = vsel %vm139_vm3, %v137_v33, 0.0 }
 0x1f7   :  { %v141_v35 = vrot.slane %v140_v34, 4  ;;  %v136_v36 = vpop.xlane.xlu1 %135 }
 0x1f8   :  { %v138_v37 = vmul.f32 %v191_v8, %v136_v36 }
 0x1f9   :  { %v142_v38 = vadd.f32 %v141_v35, %v140_v34 }
 0x1fa   :  { %v147_v39 = vsel %vm139_vm3, %v138_v37, 0.0 }
 0x1fb   :  { %v143_v40 = vrot.slane %v142_v38, 2  ;;  %v148_v41 = vrot.slane %v147_v39, 4 }
 0x1fd   :  { %v144_v42 = vadd.f32 %v143_v40, %v142_v38  ;;  %v149_v43 = vadd.f32 %v148_v41, %v147_v39 }
 0x1ff   :  { %v145_v44 = vrot.slane %v144_v42, 1  ;;  %v150_v45 = vrot.slane %v149_v43, 2 }
 0x201   :  { %v146_v46 = vadd.f32 %v145_v44, %v144_v42  ;;  %v151_v47 = vadd.f32 %v150_v45, %v149_v43 }
 0x203   :  { %v152_v48 = vrot.slane %v151_v47, 1  ;;  %v154_v49 = vmul.f32 0.17677669, %v146_v46 }
 0x205   :  { %v153_v50 = vadd.f32 %v152_v48, %v151_v47  ;;  %v158_v53 = vadd.f32 %v157_v51, %v154_v49 }
 0x207   :  { %v155_v52 = vmul.f32 0.17677669, %v153_v50 }
 0x209   :  { %v159_v54 = vadd.f32 %v157_v51, %v155_v52 }
 0x20b   :  { %v163_v55 = vsel %vm162_vm4, %v159_v54, %v158_v53 }
 0x20c   :  { %164 = vrot.lane.b32.xlu0 %v163_v55, %s203_s25 }
 0x27e   :  { %v165_v56 = vpop.permute.xlu0 %164 }
 0x27f   :  { %168 = vst.msk [vmem:[%s251_s3] sm:$0x3] %vm167_vm5, %v165_v56 }

</bundles_post_ra>
